<compile_context>
chip_gen: v5e
topology: v5e:2x2
jax: 0.10.0
libtpu: 0.0.40
codegen_flags: <defaults>
</compile_context>

<pallas_src>
import jax
import jax.numpy as jnp
from jax.experimental import pallas as pl
from jax.experimental.pallas import tpu as pltpu

PENALTY_WEIGHT = 1.0
_LANES = 128


def _partial_sums_kernel(pred_ref, tgt_ref, out_ref, acc_sq_ref, acc_relu_ref):
    """Per-split partial sums: out[0,0] = sum((p-t)^2), out[0,1] = sum(relu(-p))."""
    k = pl.program_id(1)

    # init vector accumulators at the start of this split's stream
    @pl.when(k == 0)
    def _():
        acc_sq_ref[...] = jnp.zeros_like(acc_sq_ref)
        acc_relu_ref[...] = jnp.zeros_like(acc_relu_ref)

    pred = pred_ref[...].astype(jnp.float32)
    tgt = tgt_ref[...].astype(jnp.float32)

    d = pred - tgt
    acc_sq_ref[...] += d * d                          # VPU elementwise accumulate
    acc_relu_ref[...] += jnp.maximum(-pred, 0.0)      # VPU elementwise accumulate

    # single cross-lane reduce per split, on the last step
    @pl.when(k == pl.num_programs(1) - 1)
    def _():
        out_ref[0, 0] = jnp.sum(acc_sq_ref[...])
        out_ref[0, 1] = jnp.sum(acc_relu_ref[...])


def fielding_loss(predictions, targets, penalty_weight=PENALTY_WEIGHT, block_rows=1024):
    assert predictions.shape == targets.shape
    total_elems = int(predictions.size)               # TRUE element count (pre-padding)
    assert total_elems > 0

    # ---- lane-dense layout: flatten -> zero-pad -> (rows, 128) ----
    flat_pred = predictions.reshape(-1)
    flat_tgt = targets.reshape(-1)

    rows = -(-total_elems // _LANES)                  # ceil
    br = max(8, min(block_rows, ((rows + 7) // 8) * 8))
    br = ((br + 7) // 8) * 8                          # sublane multiple
    n_blocks = -(-rows // br)

    # 2-way parallel split (megacore on v7x) when there is enough work.
    n_splits = 2 if n_blocks >= 2 else 1
    steps = -(-n_blocks // n_splits)
    padded_rows = n_splits * steps * br
    pad = padded_rows * _LANES - total_elems
    if pad:
        # zero padding contributes 0 to both sums -> no masking needed
        flat_pred = jnp.pad(flat_pred, (0, pad))
        flat_tgt = jnp.pad(flat_tgt, (0, pad))

    pred2d = flat_pred.reshape(padded_rows, _LANES)
    tgt2d = flat_tgt.reshape(padded_rows, _LANES)

    grid = (n_splits, steps)
    in_map = lambda s, k: (s * steps + k, 0)

    partials = pl.pallas_call(
        _partial_sums_kernel,
        out_shape=jax.ShapeDtypeStruct((n_splits, 2), jnp.float32),
        grid_spec=pltpu.PrefetchScalarGridSpec(
            num_scalar_prefetch=0,
            grid=grid,
            in_specs=[
                pl.BlockSpec((br, _LANES), in_map),
                pl.BlockSpec((br, _LANES), in_map),
            ],
            out_specs=pl.BlockSpec((1, 2), lambda s, k: (s, 0),
                                   memory_space=pltpu.SMEM),
            scratch_shapes=[
                pltpu.VMEM((br, _LANES), jnp.float32),   # sum of squared error
                pltpu.VMEM((br, _LANES), jnp.float32),   # sum of relu(-pred)
            ],
        ),
        compiler_params=pltpu.CompilerParams(
            dimension_semantics=("parallel", "arbitrary")),
    )(pred2d, tgt2d)

    # tiny epilogue in plain JAX: combine per-split partials, take means, mix.
    sum_sq = jnp.sum(partials[:, 0])
    sum_relu = jnp.sum(partials[:, 1])
    inv_n = jnp.float32(1.0 / total_elems)
    mse = sum_sq * inv_n
    penalty = jnp.float32(penalty_weight) * (sum_relu * inv_n)
    return mse + jnp.float32(0.5) * penalty


def fielding_loss_ref(predictions, targets, penalty_weight=PENALTY_WEIGHT):
    p = predictions.astype(jnp.float32)
    t = targets.astype(jnp.float32)
    mse = jnp.mean((p - t) ** 2)
    penalty = penalty_weight * jnp.mean(jnp.maximum(-p, 0.0))
    return mse + 0.5 * penalty


if __name__ == "__main__":
    key = jax.random.PRNGKey(0)
    k1, k2 = jax.random.split(key)
    # (batch=16, 4 fielding-outcome logits) — matches the module's predictions[:, 0..3] use
    predictions = jax.random.normal(k1, (16, 4), dtype=jnp.float32)
    targets = jax.random.normal(k2, (16, 4), dtype=jnp.float32)

    loss = fielding_loss(predictions, targets)
    jax.block_until_ready(loss)
    ref = fielding_loss_ref(predictions, targets)
    assert jnp.allclose(loss, ref, rtol=1e-5, atol=1e-6), (loss, ref)

    # also exercise a larger, non-aligned shape to hit the multi-block / 2-split path
    k3, k4 = jax.random.split(k2)
    big_p = jax.random.normal(k3, (4099, 4), dtype=jnp.float32)
    big_t = jax.random.normal(k4, (4099, 4), dtype=jnp.float32)
    big_loss = fielding_loss(big_p, big_t, block_rows=64)
    jax.block_until_ready(big_loss)
    big_ref = fielding_loss_ref(big_p, big_t)
    assert jnp.allclose(big_loss, big_ref, rtol=1e-5, atol=1e-6), (big_loss, big_ref)

    print("KERNEL_OK")
</pallas_src>

<mosaic_0001>
module attributes {stable_mosaic.version = 11 : i64} {
  func.func @_partial_sums_kernel(%arg0: i32, %arg1: i32, %arg2: memref<8x128xf32, #tpu.memory_space<vmem>>, %arg3: memref<8x128xf32, #tpu.memory_space<vmem>>, %arg4: memref<1x2xf32, #tpu.memory_space<smem>>, %arg5: memref<8x128xf32, #tpu.memory_space<vmem>>, %arg6: memref<8x128xf32, #tpu.memory_space<vmem>>) attributes {dimension_semantics = [#tpu.dimension_semantics<parallel>, #tpu.dimension_semantics<arbitrary>], iteration_bounds = array<i64: 1, 1>, scalar_prefetch = 0 : i64, scratch_operands = 2 : i64, tpu.core_type = #tpu.core_type<tc>, window_params = [{transform_indices = @transform_0, window_bounds = array<i64: 8, 128>}, {transform_indices = @transform_1, window_bounds = array<i64: 8, 128>}, {transform_indices = @transform_2, window_bounds = array<i64: 1, 2>}]} {
    %c0_i32 = arith.constant 0 : i32
    %0 = arith.cmpi eq, %arg1, %c0_i32 : i32
    %1 = arith.extui %0 : i1 to i32
    %c0_i32_0 = arith.constant 0 : i32
    %2 = arith.cmpi ne, %1, %c0_i32_0 : i32
    scf.if %2 {
      %cst_15 = arith.constant 0.000000e+00 : f32
      %20 = vector.broadcast %cst_15 : f32 to vector<8x128xf32>
      %c0_16 = arith.constant 0 : index
      %c0_17 = arith.constant 0 : index
      %21 = vector.load %arg5[%c0_16, %c0_17] : memref<8x128xf32, #tpu.memory_space<vmem>>, vector<8x128xf32>
      tpu.vector_store %arg5[%c0_16, %c0_17], %20 {strides = array<i32>} : memref<8x128xf32, #tpu.memory_space<vmem>>, vector<8x128xf32>,
      %cst_18 = arith.constant 0.000000e+00 : f32
      %22 = vector.broadcast %cst_18 : f32 to vector<8x128xf32>
      %c0_19 = arith.constant 0 : index
      %c0_20 = arith.constant 0 : index
      %23 = vector.load %arg6[%c0_19, %c0_20] : memref<8x128xf32, #tpu.memory_space<vmem>>, vector<8x128xf32>
      tpu.vector_store %arg6[%c0_19, %c0_20], %22 {strides = array<i32>} : memref<8x128xf32, #tpu.memory_space<vmem>>, vector<8x128xf32>,
    } else {
    }
    %c0 = arith.constant 0 : index
    %c0_1 = arith.constant 0 : index
    %3 = vector.load %arg2[%c0, %c0_1] : memref<8x128xf32, #tpu.memory_space<vmem>>, vector<8x128xf32>
    %c0_2 = arith.constant 0 : index
    %c0_3 = arith.constant 0 : index
    %4 = vector.load %arg3[%c0_2, %c0_3] : memref<8x128xf32, #tpu.memory_space<vmem>>, vector<8x128xf32>
    %5 = arith.subf %3, %4 : vector<8x128xf32>
    %c0_4 = arith.constant 0 : index
    %c0_5 = arith.constant 0 : index
    %6 = vector.load %arg5[%c0_4, %c0_5] : memref<8x128xf32, #tpu.memory_space<vmem>>, vector<8x128xf32>
    %7 = arith.mulf %5, %5 : vector<8x128xf32>
    %8 = arith.addf %6, %7 : vector<8x128xf32>
    %c0_6 = arith.constant 0 : index
    %c0_7 = arith.constant 0 : index
    %9 = vector.load %arg5[%c0_6, %c0_7] : memref<8x128xf32, #tpu.memory_space<vmem>>, vector<8x128xf32>
    tpu.vector_store %arg5[%c0_6, %c0_7], %8 {strides = array<i32>} : memref<8x128xf32, #tpu.memory_space<vmem>>, vector<8x128xf32>,
    %c0_8 = arith.constant 0 : index
    %c0_9 = arith.constant 0 : index
    %10 = vector.load %arg6[%c0_8, %c0_9] : memref<8x128xf32, #tpu.memory_space<vmem>>, vector<8x128xf32>
    %cst = arith.constant 0.000000e+00 : f32
    %11 = vector.broadcast %cst : f32 to vector<8x128xf32>
    %12 = arith.subf %11, %3 : vector<8x128xf32>
    %cst_10 = arith.constant 0.000000e+00 : f32
    %13 = vector.broadcast %cst_10 : f32 to vector<8x128xf32>
    %14 = arith.maximumf %12, %13 : vector<8x128xf32>
    %15 = arith.addf %10, %14 : vector<8x128xf32>
    %c0_11 = arith.constant 0 : index
    %c0_12 = arith.constant 0 : index
    %16 = vector.load %arg6[%c0_11, %c0_12] : memref<8x128xf32, #tpu.memory_space<vmem>>, vector<8x128xf32>
    tpu.vector_store %arg6[%c0_11, %c0_12], %15 {strides = array<i32>} : memref<8x128xf32, #tpu.memory_space<vmem>>, vector<8x128xf32>,
    %c0_i32_13 = arith.constant 0 : i32
    %17 = arith.cmpi eq, %arg1, %c0_i32_13 : i32
    %18 = arith.extui %17 : i1 to i32
    %c0_i32_14 = arith.constant 0 : i32
    %19 = arith.cmpi ne, %18, %c0_i32_14 : i32
    scf.if %19 {
      %c0_15 = arith.constant 0 : index
      %c0_16 = arith.constant 0 : index
      %20 = vector.load %arg5[%c0_15, %c0_16] : memref<8x128xf32, #tpu.memory_space<vmem>>, vector<8x128xf32>
      %21 = vector.shape_cast %20 : vector<8x128xf32> to vector<1x8x128xf32>
      %cst_17 = arith.constant dense<0.000000e+00> : vector<1xf32>
      %22 = vector.multi_reduction <add>, %21, %cst_17 [1, 2] : vector<1x8x128xf32> to vector<1xf32>
      %23 = vector.shape_cast %22 : vector<1xf32> to vector<1x1x1xf32>
      %24 = vector.extract %23[0, 0, 0] : f32 from vector<1x1x1xf32>
      %c0_18 = arith.constant 0 : index
      %c0_19 = arith.constant 0 : index
      %25 = memref.load %arg4[%c0_18, %c0_19] : memref<1x2xf32, #tpu.memory_space<smem>>
      memref.store %24, %arg4[%c0_18, %c0_19] : memref<1x2xf32, #tpu.memory_space<smem>>
      %c0_20 = arith.constant 0 : index
      %c0_21 = arith.constant 0 : index
      %26 = vector.load %arg6[%c0_20, %c0_21] : memref<8x128xf32, #tpu.memory_space<vmem>>, vector<8x128xf32>
      %27 = vector.shape_cast %26 : vector<8x128xf32> to vector<1x8x128xf32>
      %cst_22 = arith.constant dense<0.000000e+00> : vector<1xf32>
      %28 = vector.multi_reduction <add>, %27, %cst_22 [1, 2] : vector<1x8x128xf32> to vector<1xf32>
      %29 = vector.shape_cast %28 : vector<1xf32> to vector<1x1x1xf32>
      %30 = vector.extract %29[0, 0, 0] : f32 from vector<1x1x1xf32>
      %c0_23 = arith.constant 0 : index
      %c1 = arith.constant 1 : index
      %31 = memref.load %arg4[%c0_23, %c1] : memref<1x2xf32, #tpu.memory_space<smem>>
      memref.store %30, %arg4[%c0_23, %c1] : memref<1x2xf32, #tpu.memory_space<smem>>
    } else {
    }
    return
  }
  func.func @transform_0(%arg0: i32, %arg1: i32) -> (i32, i32) {
    %c1_i32 = arith.constant 1 : i32
    %0 = arith.muli %arg0, %c1_i32 : i32
    %1 = arith.addi %0, %arg1 : i32
    %c0_i32 = arith.constant 0 : i32
    %c0_i32_0 = arith.constant 0 : i32
    return %1, %c0_i32 : i32, i32
  }
  func.func @transform_1(%arg0: i32, %arg1: i32) -> (i32, i32) {
    %c1_i32 = arith.constant 1 : i32
    %0 = arith.muli %arg0, %c1_i32 : i32
    %1 = arith.addi %0, %arg1 : i32
    %c0_i32 = arith.constant 0 : i32
    %c0_i32_0 = arith.constant 0 : i32
    return %1, %c0_i32 : i32, i32
  }
  func.func @transform_2(%arg0: i32, %arg1: i32) -> (i32, i32) {
    %c0_i32 = arith.constant 0 : i32
    %c0_i32_0 = arith.constant 0 : i32
    return %arg0, %c0_i32 : i32, i32
  }
}

</mosaic_0001>

<bundles_post_ra>
// kernel: tpu_custom_call.1
= control target key start
LH: loop header
LB: loop body
LE: loop exit
PB: predicated region body
PF: predicated region fallthrough
CT: control target
= control target key end

     0   :  { %7 = vsyncpa [#allocation5], 0  ;;  %s210_s0 = inlined_call_operand.hbm [shape: f32[8,128], index: 0, kind: input, shape index: {}]   ;;  %s211_s1 = inlined_call_operand.hbm [shape: f32[8,128], index: 1, kind: input, shape index: {}]   ;;  %s212_s2 = inlined_call_operand.hbm [shape: f32[1,2], index: 2, kind: output, shape index: {}]  }
   0x1   :  { %8 = vsyncpa [#allocation8], 0 }
   0x2   :  { %9 = vsyncpa [#allocation6], 0  ;;  %s18_s11 = sshll.u32 %s210_s0, 4  ;;  %s183_s12 = smov [#allocation4]   ;;  %s19_s11 = int_to_ptr.hbm [resolvable:$true] %s18_s11 }
   0x3   :  { %s20_s13 = sshll.u32 %s183_s12, 4  ;;  %s32_s16 = sshll.u32 %s211_s1, 4  ;;  %s21_s13 = int_to_ptr.vmem [resolvable:$true] %s20_s13  ;;  %s33_s16 = int_to_ptr.hbm [resolvable:$true] %s32_s16 }
   0x4   :  { %23 = dma.hbm_to_vmem [thread:$0]  %s19_s11, 128, %s21_s13, [#allocation5]  }
   0x5   :  { %s184_s17 = smov [#allocation7]  }
   0x6   :  { %s34_s18 = sshll.u32 %s184_s17, 4  ;;  %s35_s18 = int_to_ptr.vmem [resolvable:$true] %s34_s18 }
   0x7   :  { %37 = dma.hbm_to_vmem [thread:$0]  %s33_s16, 128, %s35_s18, [#allocation8]  }
   0x8   :  { %177 = dma.done.wait [#allocation5], 128  }
   0x9   :  { %178 = vsyncadd [#allocation5], 4294967168 }
   0xa   :  { %179 = dma.done.wait [#allocation8], 128  }
   0xb   :  { %180 = vsyncadd [#allocation8], 4294967168  ;;  %v54_v0 = vld [vmem:[#allocation4] sm:$0xff]  ;;  %v55_v1 = vld [vmem:[#allocation7] sm:$0xff]  ;;  %s98_s20 = sshll.u32 %s212_s2, 4  ;;  %s185_s22 = smov [#allocation9]   ;;  %s99_s20 = int_to_ptr.hbm [resolvable:$true] %s98_s20 }
   0xc   :  { %v56_v2 = vsub.f32 %v54_v0, %v55_v1  ;;  %v62_v4 = vsub.f32 0.0, %v54_v0 }
   0xe   :  { %v58_v3 = vmul.f32 %v56_v2, %v56_v2  ;;  %v63_v5 = vmax.f32 %v62_v4, 0.0 }
  0x10   :  { %70 = vadd.xlane.f32.xlu0 %v58_v3 }
  0x18   :  { %82 = vadd.xlane.f32.xlu0 %v63_v5 }
  0x83   :  { %v71_v6 = vpop.xlane.xlu0 %70 }
  0x84   :  { %v72_v7 = vrot.slane %v71_v6, 4 }
  0x86   :  { %v73_v8 = vadd.f32 %v72_v7, %v71_v6 }
  0x88   :  { %v74_v9 = vrot.slane %v73_v8, 2 }
  0x8a   :  { %v75_v10 = vadd.f32 %v74_v9, %v73_v8 }
  0x8b   :  { %v83_v11 = vpop.xlane.xlu0 %82 }
  0x8c   :  { %v84_v12 = vrot.slane %v83_v11, 4  ;;  %v76_v13 = vrot.slane %v75_v10, 1 }
  0x8e   :  { %v85_v14 = vadd.f32 %v84_v12, %v83_v11  ;;  %v77_v15 = vadd.f32 %v76_v13, %v75_v10 }
  0x90   :  { %v86_v16 = vrot.slane %v85_v14, 2  ;;  %110 = vpush %v77_v15 }
  0x92   :  { %v87_v17 = vadd.f32 %v86_v16, %v85_v14 }
  0x94   :  { %v88_v18 = vrot.slane %v87_v17, 1 }
  0x96   :  { %v89_v19 = vadd.f32 %v88_v18, %v87_v17 }
  0x98   :  { %112 = vpush %v89_v19 }
  0xc1   :  { %s111_s0 = spop %110 }
  0xc2   :  { %80 = sst [smem:[#allocation9]] %s111_s0 }
  0xc9   :  { %s113_s21 = spop %112 }
  0xca   :  { %92 = sst [smem:[#allocation9 + $0x1]] %s113_s21 }
  0xcb   :  { %101 = dma.smem_to_hbm %s185_s22, 16, %s99_s20, [#allocation6]  }
  0xcc   :  { %181 = dma.done.wait [#allocation6], 16  }
  0xcd   :  { %182 = vsyncadd [#allocation6], 4294967280 }
  0xce   :  { %106 = sfence }
  0xcf   :  { %107 = vsyncpa [#allocation5], 1 }
  0xd0   :  { %108 = vsyncpa [#allocation8], 1 }
  0xd1   :  { %109 = vsyncpa [#allocation6], 1 }

</bundles_post_ra>
